<compile_context>
chip_gen: v7x
topology: tpu7x:2x2x1
jax: 0.10.0
libtpu: 0.0.40
codegen_flags: <defaults>
</compile_context>

<pallas_src>
import functools
import math

import jax
import jax.numpy as jnp
from jax import lax
from jax.experimental import pallas as pl
from jax.experimental.pallas import tpu as pltpu

_MASK_VALUE = -1e30                    # finite "-inf" (no NaN on fully masked rows)
_VMEM_LIMIT = 32 * 1024 * 1024         # safe on v5e/v6e/v7x; raise for very long T


# ---------------------------------------------------------------------------
# Tiled linear projection: y = x @ W_T + b  (x, W in bf16, accumulate in f32)
# ---------------------------------------------------------------------------
def _linear_kernel(x_ref, w_ref, b_ref, o_ref):
    acc = jnp.dot(x_ref[...], w_ref[...], preferred_element_type=jnp.float32)
    o_ref[...] = (acc + b_ref[...]).astype(o_ref.dtype)


def linear(x, w_t, b, out_dtype=jnp.bfloat16, tm=512):
    """x: (M, K) bf16, w_t: (K, N) bf16 (pre-transposed), b: (N,) f32 -> (M, N)."""
    M, K = x.shape
    N = w_t.shape[1]
    tm = M if M <= tm else tm          # full-M block for small M, else 512-row tiles
    grid_m = pl.cdiv(M, tm)
    return pl.pallas_call(
        _linear_kernel,
        out_shape=jax.ShapeDtypeStruct((M, N), out_dtype),
        grid=(grid_m,),
        in_specs=[
            pl.BlockSpec((tm, K), lambda i: (i, 0)),    # streamed row tile of x
            pl.BlockSpec((K, N), lambda i: (0, 0)),     # resident weight
            pl.BlockSpec((1, N), lambda i: (0, 0)),     # resident bias
        ],
        out_specs=pl.BlockSpec((tm, N), lambda i: (i, 0)),
        compiler_params=pltpu.CompilerParams(
            dimension_semantics=("parallel",),
            vmem_limit_bytes=_VMEM_LIMIT),
    )(x, w_t, b.reshape(1, N))


# ---------------------------------------------------------------------------
# Relative-position attention: one batch per grid step, all heads inside.
# ---------------------------------------------------------------------------
def _rel_shift(x, t2):
    """x: (T1, N) f32 -> (T1, t2) with out[i, j] = x[i, (T1-1-i) + j].

    Per-row left circular shift by (T1-1-i), composed from log2(T1) static lane
    rolls (concat of two static slices) + per-row selects.  Since
    (T1-1-i) + j <= N-1 for the kept columns, circular wrap never reaches them.
    """
    t1, n = x.shape
    shift = (t1 - 1) - lax.broadcasted_iota(jnp.int32, (t1, 1), 0)   # left shift per row
    k = 1
    while k < t1:
        rolled = jnp.concatenate([x[:, k:], x[:, :k]], axis=1)       # roll left by k
        x = jnp.where((shift & k) != 0, rolled, x)
        k *= 2
    return x[:, :t2]


def _attn_kernel(q_ref, k_ref, v_ref, p_ref, bu_ref, bv_ref, mask_ref,
                 chunk_ref, o_ref, *, num_heads):
    q = q_ref[...]            # (T1, E) bf16
    k = k_ref[...]            # (T2, E) bf16
    v = v_ref[...]            # (T2, E) bf16
    p = p_ref[...]            # (N,  E) bf16
    bu = bu_ref[...]          # (1, E)  bf16   pos_bias_u (head-major flattened)
    bv = bv_ref[...]          # (1, E)  bf16   pos_bias_v
    masked = jnp.logical_or(mask_ref[...] > 0, chunk_ref[...] > 0)   # (T1, T2) bool

    t1, e = q.shape
    t2 = k.shape[0]
    dk = e // num_heads
    scale = 1.0 / math.sqrt(dk)
    contract = (((1,), (1,)), ((), ()))          # a @ b.T (contract over d_k)

    ctx_heads = []
    for h in range(num_heads):                   # small static unroll over heads
        sl = slice(h * dk, (h + 1) * dk)
        q_h, k_h, v_h, p_h = q[:, sl], k[:, sl], v[:, sl], p[:, sl]
        # matrix_ac = (q + pos_bias_u) @ k^T                     -> (T1, T2)
        ac = lax.dot_general(q_h + bu[:, sl], k_h, contract,
                             preferred_element_type=jnp.float32)
        # matrix_bd = rel_shift((q + pos_bias_v) @ p^T)          -> (T1, T2)
        bd = _rel_shift(
            lax.dot_general(q_h + bv[:, sl], p_h, contract,
                            preferred_element_type=jnp.float32), t2)
        scores = jnp.where(masked, _MASK_VALUE, (ac + bd) * scale)
        m = jnp.max(scores, axis=-1, keepdims=True)
        ex = jnp.exp(scores - m)
        denom = jnp.sum(ex, axis=-1, keepdims=True)
        attn = ex * pl.reciprocal(denom, approx=True)
        attn = jnp.where(masked, 0.0, attn)      # masked_fill(mask, 0.0)
        ctx_heads.append(jnp.dot(attn.astype(v_h.dtype), v_h,
                                 preferred_element_type=jnp.float32))
    # lane-dense (T1, E) store
    o_ref[...] = jnp.concatenate(ctx_heads, axis=-1).astype(o_ref.dtype)


def rel_attention(q, k, v, p, bias_u, bias_v, mask_i32, chunk_i32, num_heads):
    """q:(B,T1,E)  k,v:(B,T2,E)  p:(B,N,E)  biases:(1,E)  mask:(B,1,T2)  chunk:(1,T1,T2)."""
    B, T1, E = q.shape
    T2 = k.shape[1]
    N = p.shape[1]
    H = num_heads
    dk = E // H
    flops = 2 * B * H * T1 * dk * (2 * T2 + N)
    bytes_accessed = (2 * (q.size + k.size + v.size + p.size + B * T1 * E)
                      + 4 * (mask_i32.size + chunk_i32.size))
    kernel = functools.partial(_attn_kernel, num_heads=H)
    return pl.pallas_call(
        kernel,
        out_shape=jax.ShapeDtypeStruct((B, T1, E), jnp.bfloat16),
        grid=(B,),
        in_specs=[
            pl.BlockSpec((None, T1, E), lambda b: (b, 0, 0)),
            pl.BlockSpec((None, T2, E), lambda b: (b, 0, 0)),
            pl.BlockSpec((None, T2, E), lambda b: (b, 0, 0)),
            pl.BlockSpec((None, N, E), lambda b: (b, 0, 0)),
            pl.BlockSpec((1, E), lambda b: (0, 0)),          # pos_bias_u (resident)
            pl.BlockSpec((1, E), lambda b: (0, 0)),          # pos_bias_v (resident)
            pl.BlockSpec((None, 1, T2), lambda b: (b, 0, 0)),   # source mask
            pl.BlockSpec((None, T1, T2), lambda b: (0, 0, 0)),  # chunk mask (resident)
        ],
        out_specs=pl.BlockSpec((None, T1, E), lambda b: (b, 0, 0)),
        compiler_params=pltpu.CompilerParams(
            dimension_semantics=("parallel",),
            vmem_limit_bytes=_VMEM_LIMIT),
        cost_estimate=pl.CostEstimate(
            flops=int(flops), transcendentals=int(B * H * T1 * T2),
            bytes_accessed=int(bytes_accessed)),
    )(q, k, v, p, bias_u, bias_v, mask_i32, chunk_i32)


# ---------------------------------------------------------------------------
# Full module forward (glue in plain JAX, compute in Pallas)
# ---------------------------------------------------------------------------
def init_params(key, num_heads, embed_size):
    dk = embed_size // num_heads
    ks = jax.random.split(key, 11)

    def w(k, shape, scale=0.1):
        return jax.random.normal(k, shape, jnp.float32) * scale

    return dict(
        wq_t=w(ks[0], (embed_size, embed_size)), bq=w(ks[1], (embed_size,)),
        wk_t=w(ks[2], (embed_size, embed_size)), bk=w(ks[3], (embed_size,)),
        wv_t=w(ks[4], (embed_size, embed_size)), bv=w(ks[5], (embed_size,)),
        wo_t=w(ks[6], (embed_size, embed_size)), bo=w(ks[7], (embed_size,)),
        wpos_t=w(ks[8], (embed_size, embed_size)),          # linear_pos has no bias
        pos_bias_u=w(ks[9], (num_heads, dk)),
        pos_bias_v=w(ks[10], (num_heads, dk)),
    )


def rel_pos_mha_chunk_forward(params, query, key, value, pos_enc, mask,
                              chunk_mask, num_heads):
    """Pallas forward of RelPositionMultiHeadedAttentionChunk
    (simplified_attention_score=False, dropout=0, left_context=0)."""
    B, T1, E = query.shape
    T2 = key.shape[1]
    N = pos_enc.shape[1]
    bf16 = jnp.bfloat16

    # ---- projections (bf16 MXU matmuls, f32 accumulation) -------------------
    if (query is key) and (key is value):
        # fused QKV: one activation read, one kernel launch, (E, 3E) weight.
        w_qkv = jnp.concatenate(
            [params["wq_t"], params["wk_t"], params["wv_t"]], axis=1).astype(bf16)
        b_qkv = jnp.concatenate([params["bq"], params["bk"], params["bv"]])
        qkv = linear(query.reshape(B * T1, E).astype(bf16), w_qkv, b_qkv)
        q = qkv[:, :E].reshape(B, T1, E)
        k = qkv[:, E:2 * E].reshape(B, T2, E)
        v = qkv[:, 2 * E:].reshape(B, T2, E)
    else:
        q = linear(query.reshape(B * T1, E).astype(bf16),
                   params["wq_t"].astype(bf16), params["bq"]).reshape(B, T1, E)
        k = linear(key.reshape(B * T2, E).astype(bf16),
                   params["wk_t"].astype(bf16), params["bk"]).reshape(B, T2, E)
        v = linear(value.reshape(B * T2, E).astype(bf16),
                   params["wv_t"].astype(bf16), params["bv"]).reshape(B, T2, E)
    p = linear(pos_enc.reshape(B * N, E).astype(bf16),
               params["wpos_t"].astype(bf16),
               jnp.zeros((E,), jnp.float32)).reshape(B, N, E)

    # ---- masks: small integer tensors, combined inside the kernel -----------
    mask_i32 = mask.astype(jnp.int32).reshape(B, 1, T2)
    if chunk_mask is None:
        chunk_i32 = jnp.zeros((1, T1, T2), jnp.int32)
    else:
        chunk_i32 = chunk_mask.astype(jnp.int32).reshape(1, T1, T2)

    bias_u = params["pos_bias_u"].astype(bf16).reshape(1, E)
    bias_v = params["pos_bias_v"].astype(bf16).reshape(1, E)

    ctx = rel_attention(q, k, v, p, bias_u, bias_v, mask_i32, chunk_i32,
                        num_heads)                          # (B, T1, E) bf16
    out = linear(ctx.reshape(B * T1, E), params["wo_t"].astype(bf16),
                 params["bo"], out_dtype=jnp.float32)
    return out.reshape(B, T1, E)


# ---------------------------------------------------------------------------
# Pure-JAX reference (mirrors the kernel's bf16 matmul precision)
# ---------------------------------------------------------------------------
def reference_forward(params, query, key, value, pos_enc, mask, chunk_mask,
                      num_heads):
    bf16 = jnp.bfloat16
    B, T1, E = query.shape
    T2 = key.shape[1]
    N = pos_enc.shape[1]
    H = num_heads
    dk = E // H

    def lin(x, wt, b):
        y = jnp.dot(x.astype(bf16), wt.astype(bf16),
                    preferred_element_type=jnp.float32)
        if b is not None:
            y = y + b
        return y.astype(bf16)

    q = lin(query, params["wq_t"], params["bq"]).reshape(B, T1, H, dk).transpose(0, 2, 1, 3)
    k = lin(key, params["wk_t"], params["bk"]).reshape(B, T2, H, dk).transpose(0, 2, 1, 3)
    v = lin(value, params["wv_t"], params["bv"]).reshape(B, T2, H, dk).transpose(0, 2, 1, 3)
    p = lin(pos_enc, params["wpos_t"], None).reshape(B, N, H, dk).transpose(0, 2, 1, 3)

    bu = params["pos_bias_u"].astype(bf16)[None, :, None, :]
    bv_ = params["pos_bias_v"].astype(bf16)[None, :, None, :]
    ac = jnp.einsum("bhqd,bhkd->bhqk", q + bu, k, preferred_element_type=jnp.float32)
    bd_full = jnp.einsum("bhqd,bhnd->bhqn", q + bv_, p, preferred_element_type=jnp.float32)
    idx = (T1 - 1) - jnp.arange(T1)[:, None] + jnp.arange(T2)[None, :]
    bd = jnp.take_along_axis(bd_full,
                             jnp.broadcast_to(idx[None, None], (B, H, T1, T2)),
                             axis=-1)

    scores = (ac + bd) / math.sqrt(dk)
    if chunk_mask is None:
        m = jnp.broadcast_to(mask[:, None, None, :], (B, 1, T1, T2))
    else:
        m = chunk_mask[None, None] | mask[:, None, None, :]
    scores = jnp.where(m, _MASK_VALUE, scores)
    attn = jax.nn.softmax(scores, axis=-1)
    attn = jnp.where(m, 0.0, attn)
    ctx = jnp.einsum("bhqk,bhkd->bhqd", attn.astype(bf16), v,
                     preferred_element_type=jnp.float32)
    ctx = ctx.astype(bf16).transpose(0, 2, 1, 3).reshape(B, T1, E)
    out = jnp.dot(ctx, params["wo_t"].astype(bf16),
                  preferred_element_type=jnp.float32) + params["bo"]
    return out


if __name__ == "__main__":
    B, T, E, H = 2, 8, 32, 4          # batch, seq, embed_size, num_heads
    N = 2 * T - 1                     # pos_enc length (left_context = 0)

    root = jax.random.PRNGKey(0)
    kx, kpe, kparams = jax.random.split(root, 3)
    x = jax.random.normal(kx, (B, T, E), jnp.float32)       # self-attn: q = k = v
    pos_enc = jax.random.normal(kpe, (B, N, E), jnp.float32)

    # source padding mask (True = masked): batch 0 full, batch 1 last 2 padded
    lengths = jnp.array([T, T - 2])
    mask = jnp.arange(T)[None, :] >= lengths[:, None]          # (B, T)
    # chunked causal mask (chunk size 4): cannot attend to future chunks
    chunk_ids = jnp.arange(T) // 4
    chunk_mask = chunk_ids[None, :] > chunk_ids[:, None]       # (T, T)

    params = init_params(kparams, H, E)

    out = rel_pos_mha_chunk_forward(params, x, x, x, pos_enc, mask, chunk_mask, H)
    out = jax.block_until_ready(out)

    ref = reference_forward(params, x, x, x, pos_enc, mask, chunk_mask, H)

    assert out.shape == (B, T, E), out.shape
    assert bool(jnp.all(jnp.isfinite(out)))
    err = float(jnp.max(jnp.abs(out - ref)))
    if not jnp.allclose(out, ref, atol=2e-2, rtol=2e-2):
        raise RuntimeError(f"mismatch vs reference, max abs diff = {err}")
    print("KERNEL_OK")
</pallas_src>

<mosaic_0001>
module attributes {stable_mosaic.version = 11 : i64} {
  func.func @_linear_kernel(%arg0: i32, %arg1: memref<16x32xbf16, #tpu.memory_space<vmem>>, %arg2: memref<32x96xbf16, #tpu.memory_space<vmem>>, %arg3: memref<1x96xf32, #tpu.memory_space<vmem>>, %arg4: memref<16x96xbf16, #tpu.memory_space<vmem>>) attributes {dimension_semantics = [#tpu.dimension_semantics<parallel>], iteration_bounds = array<i64: 1>, scalar_prefetch = 0 : i64, scratch_operands = 0 : i64, tpu.core_type = #tpu.core_type<tc>, window_params = [{transform_indices = @transform_0, window_bounds = array<i64: 16, 32>}, {pipeline_mode = #tpu.pipeline_mode<synchronous>, transform_indices = @transform_1, window_bounds = array<i64: 32, 96>}, {pipeline_mode = #tpu.pipeline_mode<synchronous>, transform_indices = @transform_2, window_bounds = array<i64: 1, 96>}, {transform_indices = @transform_3, window_bounds = array<i64: 16, 96>}]} {
    %c0 = arith.constant 0 : index
    %c0_0 = arith.constant 0 : index
    %0 = vector.load %arg1[%c0, %c0_0] : memref<16x32xbf16, #tpu.memory_space<vmem>>, vector<16x32xbf16>
    %c0_1 = arith.constant 0 : index
    %c0_2 = arith.constant 0 : index
    %1 = vector.load %arg2[%c0_1, %c0_2] : memref<32x96xbf16, #tpu.memory_space<vmem>>, vector<32x96xbf16>
    %cst = arith.constant dense<0.000000e+00> : vector<16x96xf32>
    %2 = tpu.matmul %0, %1, %cst {dimension_numbers = #tpu.dot_dimension_numbers<[1], [0], [0], [1], [0, 0, 1, 1], [], []>} : vector<16x32xbf16>, vector<32x96xbf16>, vector<16x96xf32> -> vector<16x96xf32>
    %c0_3 = arith.constant 0 : index
    %c0_4 = arith.constant 0 : index
    %3 = vector.load %arg3[%c0_3, %c0_4] : memref<1x96xf32, #tpu.memory_space<vmem>>, vector<1x96xf32>
    %4 = vector.broadcast %3 : vector<1x96xf32> to vector<16x96xf32>
    %5 = arith.addf %2, %4 : vector<16x96xf32>
    %6 = arith.truncf %5 : vector<16x96xf32> to vector<16x96xbf16>
    %c0_5 = arith.constant 0 : index
    %c0_6 = arith.constant 0 : index
    %7 = vector.load %arg4[%c0_5, %c0_6] : memref<16x96xbf16, #tpu.memory_space<vmem>>, vector<16x96xbf16>
    tpu.vector_store %arg4[%c0_5, %c0_6], %6 {strides = array<i32>} : memref<16x96xbf16, #tpu.memory_space<vmem>>, vector<16x96xbf16>,
    return
  }
  func.func @transform_0(%arg0: i32) -> (i32, i32) {
    %c0_i32 = arith.constant 0 : i32
    %c0_i32_0 = arith.constant 0 : i32
    return %arg0, %c0_i32 : i32, i32
  }
  func.func @transform_1(%arg0: i32) -> (i32, i32) {
    %c0_i32 = arith.constant 0 : i32
    %c0_i32_0 = arith.constant 0 : i32
    %c0_i32_1 = arith.constant 0 : i32
    return %c0_i32, %c0_i32_0 : i32, i32
  }
  func.func @transform_2(%arg0: i32) -> (i32, i32) {
    %c0_i32 = arith.constant 0 : i32
    %c0_i32_0 = arith.constant 0 : i32
    %c0_i32_1 = arith.constant 0 : i32
    return %c0_i32, %c0_i32_0 : i32, i32
  }
  func.func @transform_3(%arg0: i32) -> (i32, i32) {
    %c0_i32 = arith.constant 0 : i32
    %c0_i32_0 = arith.constant 0 : i32
    return %arg0, %c0_i32 : i32, i32
  }
}

</mosaic_0001>

<bundles_post_ra>
// kernel: tpu_custom_call.1
= control target key start
LH: loop header
LB: loop body
LE: loop exit
PB: predicated region body
PF: predicated region fallthrough
CT: control target
= control target key end

     0   :  { %8 = vsyncpa [#allocation3], 0  ;;  %s325_s0 = inlined_call_operand.hbm [shape: bf16[16,32], index: 0, kind: input, shape index: {}]   ;;  %s326_s1 = inlined_call_operand.hbm [shape: bf16[32,96], index: 1, kind: input, shape index: {}]   ;;  %s327_s2 = inlined_call_operand.vmem [shape: f32[1,96], index: 2, kind: input, shape index: {}]   ;;  %s328_s3 = inlined_call_operand.hbm [shape: bf16[16,96], index: 3, kind: output, shape index: {}]  }
   0x1   :  { %9 = vsyncpa [#allocation6], 0 }
   0x2   :  { %10 = vsyncpa [#allocation4], 0  ;;  %s250_s12 = smov [#allocation2]   ;;  %s178_s16 = scalar_lea.hbm %s325_s0, 128 }
   0x3   :  { %s16_s13 = sshll.u32 %s250_s12, 4  ;;  %p179_p0 = scmp.ne.s32.totalorder %s325_s0, %s178_s16  ;;  %s17_s13 = int_to_ptr.vmem [resolvable:$true] %s16_s13 }
   0x4   :  { %p182_p1 = scmp.lt.u32.totalorder %s178_s16, %s325_s0 }
   0x6   :  { %p184_p2 = pnand %p182_p1, %p179_p0 }
   0x8   :  { %187 = shalt.err (!%p184_p2)
}
   0x9   :  { %s188_s21 = scalar_lea.vmem %s17_s13, 128  ;;  %p193_p4 = scmp.lt.s32.totalorder %s17_s13, %s17_s13 }
   0xa   :  { %p189_p3 = scmp.ne.s32.totalorder %s17_s13, %s188_s21  ;;  %p194_p5 = scmp.lt.s32.totalorder %s188_s21, %s188_s21 }
   0xc   :  { %p195_p6 = por %p194_p5, %p193_p4 }
   0xe   :  { %p196_p7 = pnand %p195_p6, %p189_p3 }
  0x10   :  { %199 = shalt.err (!%p196_p7)
}
  0x11   :  { %s251_s22 = smov 64   ;;  %s252_s23 = smov 4  }
  0x12   :  { %22 = dma.hbm_to_vmem [thread:$0]  %s325_s0, 128, %s17_s13, [#allocation3], %s251_s22, %s251_s22, %s252_s23  }
  0x13   :  { %s253_s26 = smov [#allocation5]   ;;  %s200_s30 = scalar_lea.hbm %s326_s1, 256 }
  0x14   :  { %s28_s27 = sshll.u32 %s253_s26, 4  ;;  %p201_p8 = scmp.ne.s32.totalorder %s326_s1, %s200_s30  ;;  %s29_s27 = int_to_ptr.vmem [resolvable:$true] %s28_s27 }
  0x15   :  { %p204_p9 = scmp.lt.u32.totalorder %s200_s30, %s326_s1 }
  0x17   :  { %p206_p10 = pnand %p204_p9, %p201_p8 }
  0x19   :  { %209 = shalt.err (!%p206_p10)
}
  0x1a   :  { %s210_s8 = scalar_lea.vmem %s29_s27, 256  ;;  %p215_p12 = scmp.lt.s32.totalorder %s29_s27, %s29_s27 }
  0x1b   :  { %p211_p11 = scmp.ne.s32.totalorder %s29_s27, %s210_s8  ;;  %p216_p13 = scmp.lt.s32.totalorder %s210_s8, %s210_s8 }
  0x1d   :  { %p217_p0 = por %p216_p13, %p215_p12 }
  0x1f   :  { %p218_p1 = pnand %p217_p0, %p211_p11 }
  0x21   :  { %221 = shalt.err (!%p218_p1)
}
  0x22   :  { %34 = dma.hbm_to_vmem [thread:$0]  %s326_s1, 256, %s29_s27, [#allocation6], %s251_s22, %s251_s22, %s252_s23  }
  0x23   :  { %244 = dma.done.wait [#allocation3], 128  }
  0x24   :  { %245 = vsyncadd [#allocation3], 4294967168 }
  0x25   :  { %246 = dma.done.wait [#allocation6], 256  }
  0x26   :  { %247 = vsyncadd [#allocation6], 4294967040  ;;  %v254_v0 = vmov 0.0   ;;  %vm255_vm0 = vmmov 0   ;;  %v175_v1 = vld [vmem:[#allocation5] sm:$0xff]   ;;  %v176_v2 = vld [vmem:[#allocation5 + $0x8] sm:$0xff]  }
  0x27   :  { %160 = vmatprep.subr.bf16.mxu0 %v254_v0  ;;  %164 = vmatprep.mubr.msk.bf16.mxu0 %vm255_vm0, %v254_v0  ;;  %v177_v3 = vld [vmem:[#allocation2] sm:$0xff]   ;;  %vm74_vm1 = vcmask 261120   ;;  %vm127_vm2 = vcmask 781312   ;;  %s256_s1 = smov [#allocation7]  }
  0x28   :  { %161 = vmatpush3.bf16.msra.mxu0 %v175_v1  ;;  %v148_v4 = vld [vmem:[%s327_s2] ss:$0 sm:$0xff]  ;;  %s135_s12 = sshll.u32 %s256_s1, 4  ;;  %s136_s12 = int_to_ptr.vmem [resolvable:$true] %s135_s12 }
  0x29   :  { %162 = vmatprep.subr.bf16.mxu0 %v254_v0  ;;  %s222_s13 = scalar_lea.vmem %s136_s12, 128  ;;  %p227_p3 = scmp.lt.s32.totalorder %s136_s12, %s136_s12 }
  0x2a   :  { %p223_p2 = scmp.ne.s32.totalorder %s136_s12, %s222_s13  ;;  %p228_p4 = scmp.lt.s32.totalorder %s222_s13, %s222_s13 }
  0x2c   :  { %163 = vmatpush3.bf16.msra.mxu0 %v176_v2  ;;  %p229_p5 = por %p228_p4, %p227_p3 }
  0x2e   :  { %p230_p6 = pnand %p229_p5, %p223_p2 }
  0x2f   :  { %165 = vmatmul.mubr.msk.bf16.vlgmr.msra.gmra.mrb[0].mxu0 %vm74_vm1, %v177_v3 }
 0x102   :  { %v112_v5 = vpop.f32.mrb[0].mxu0 }
 0x103   :  { %v113_v6 = vadd.f32 %v148_v4, %v112_v5  ;;  %v166_v7 = vpop.f32.mrb[1].mxu0 }
 0x104   :  { %v115_v8 = vpop.f32.mrb[2].mxu0 }
 0x105   :  { %v155_v9 = vpack.c.bf16 %v113_v6, %v113_v6  ;;  %v116_v10 = vadd.f32 %v148_v4, %v115_v8  ;;  %v167_v11 = vpop.f32.mrb[3].mxu0 }
 0x107   :  { %v156_v12 = vpack.c.bf16 %v116_v10, %v116_v10  ;;  %128 = vst.msk [vmem:[#allocation7] sm:$0xf] %vm127_vm2, %v155_v9 }
 0x109   :  { %129 = vst.msk [vmem:[#allocation7 + $0x4] sm:$0xf] %vm127_vm2, %v156_v12 }
 0x10a   :  { %233 = shalt.err (!%p230_p6)
}
 0x10b   :  { %s234_s15 = scalar_lea.hbm %s328_s3, 128 }
 0x10c   :  { %p235_p7 = scmp.ne.s32.totalorder %s328_s3, %s234_s15  ;;  %p238_p8 = scmp.lt.u32.totalorder %s234_s15, %s328_s3 }
 0x10e   :  { %p240_p9 = pnand %p238_p8, %p235_p7 }
 0x110   :  { %243 = shalt.err (!%p240_p9)
}
 0x111   :  { %141 = dma.vmem_to_hbm [thread:$0]  %s136_s12, 128, %s328_s3, [#allocation4], %s251_s22, %s251_s22, %s252_s23  }
 0x112   :  { %248 = dma.done.wait [#allocation4], 128  }
 0x113   :  { %249 = vsyncadd [#allocation4], 4294967168 }
 0x114   :  { %145 = vsyncpa [#allocation3], 1 }
 0x115   :  { %146 = vsyncpa [#allocation6], 1 }
 0x116   :  { %147 = vsyncpa [#allocation4], 1 }

</bundles_post_ra>
